<compile_context>
chip_gen: v7x
topology: tpu7x:2x2x1
jax: 0.10.0
libtpu: 0.0.40
codegen_flags: <defaults>
</compile_context>

<pallas_src>
import jax
import jax.numpy as jnp
from jax.experimental import pallas as pl
from jax.experimental.pallas import tpu as pltpu


def gru_seq_kernel(tok_ref, emb_ref, h0_ref, wih_ref, whh_ref, bias_ref,
                   wdec_ref, bdec_ref, logits_ref, hcarry_ref):
    """One bidirectional GRU timestep + decoder per grid step; hidden carried in hcarry_ref.

    tok_ref:    (T,) int32 SMEM     scalar-prefetched token ids (consumed by index_maps)
    emb_ref:    (1, 1, H)  bf16     embedded token row (selected by BlockSpec index_map)
    h0_ref:     (1, 2H)    f32      initial hidden, packed [h_fwd | h_bwd]
    wih_ref:    (H, 6H)    bf16     fused input->hidden weights, cols [r_f|r_b|z_f|z_b|n_f|n_b]
    whh_ref:    (2H, 6H)   bf16     block-diagonal hidden->hidden weights (same col order)
    bias_ref:   (4, 2H)    f32      rows: [b_r(=bih_r+bhh_r), b_z(=bih_z+bhh_z), bih_n, bhh_n]
    wdec_ref:   (2H, O)    bf16     decoder weight on concat(h_fwd, h_bwd)
    bdec_ref:   (1, O)     f32      decoder bias
    logits_ref: (1, 1, O)  f32      per-step decoder output
    hcarry_ref: (1, 2H)    f32      carried hidden (resident across grid; also final output)
    """
    del tok_ref  # only used by the BlockSpec index_maps
    t = pl.program_id(0)
    H = wih_ref.shape[0]
    H2 = 2 * H

    @pl.when(t == 0)
    def _():
        hcarry_ref[...] = h0_ref[...]

    cdt = wih_ref.dtype                       # bf16 compute dtype for MXU inputs
    x = emb_ref[...].reshape(1, H)            # (1, H)  embedded token (bf16)
    h = hcarry_ref[...]                       # (1, 2H) previous hidden (f32)

    # 2 fused MXU pushes for all gates of both directions, f32 accumulation.
    gi = jnp.dot(x, wih_ref[...], preferred_element_type=jnp.float32)                # (1, 6H)
    gh = jnp.dot(h.astype(cdt), whh_ref[...], preferred_element_type=jnp.float32)    # (1, 6H)

    gi_r, gi_z, gi_n = gi[:, 0:H2], gi[:, H2:2 * H2], gi[:, 2 * H2:3 * H2]
    gh_r, gh_z, gh_n = gh[:, 0:H2], gh[:, H2:2 * H2], gh[:, 2 * H2:3 * H2]

    # PyTorch GRU gate math (vectorized over both directions), all in f32.
    r = jax.nn.sigmoid(gi_r + gh_r + bias_ref[0:1, :])
    z = jax.nn.sigmoid(gi_z + gh_z + bias_ref[1:2, :])
    n = jnp.tanh(gi_n + bias_ref[2:3, :] + r * (gh_n + bias_ref[3:4, :]))
    h_new = (1.0 - z) * n + z * h                                                    # (1, 2H)

    hcarry_ref[...] = h_new

    # Decoder on concat([h_fwd, h_bwd]) -- single MXU push.
    dec = jnp.dot(h_new.astype(cdt), wdec_ref[...], preferred_element_type=jnp.float32)
    logits_ref[...] = (dec + bdec_ref[...]).reshape(1, 1, -1)


def rnn_forward_seq(packed, tokens, hidden):
    """Run T single-token forward() steps fused into one pallas_call (hidden carried)."""
    V, _, H = packed["emb"].shape
    O = packed["wdec"].shape[1]
    T = int(tokens.shape[0])
    h0 = hidden[:, 0, :].reshape(1, 2 * H).astype(jnp.float32)

    cmap = lambda t, tok: (0, 0)  # resident blocks: weights / biases / carried hidden

    logits3, hout = pl.pallas_call(
        gru_seq_kernel,
        out_shape=(jax.ShapeDtypeStruct((T, 1, O), jnp.float32),
                   jax.ShapeDtypeStruct((1, 2 * H), jnp.float32)),
        grid_spec=pltpu.PrefetchScalarGridSpec(
            num_scalar_prefetch=1,
            grid=(T,),
            in_specs=[
                pl.BlockSpec((1, 1, H), lambda t, tok: (tok[t], 0, 0)),  # embedding row gather
                pl.BlockSpec((1, 2 * H), cmap),                           # initial hidden
                pl.BlockSpec((H, 6 * H), cmap),                           # fused Wih
                pl.BlockSpec((2 * H, 6 * H), cmap),                       # block-diag Whh
                pl.BlockSpec((4, 2 * H), cmap),                           # folded biases
                pl.BlockSpec((2 * H, O), cmap),                           # decoder weight
                pl.BlockSpec((1, O), cmap),                               # decoder bias
            ],
            out_specs=(
                pl.BlockSpec((1, 1, O), lambda t, tok: (t, 0, 0)),        # per-step logits
                pl.BlockSpec((1, 2 * H), cmap),                           # carried / final hidden
            ),
        ),
        compiler_params=pltpu.CompilerParams(dimension_semantics=("arbitrary",)),
    )(tokens.astype(jnp.int32), packed["emb"], h0, packed["wih"], packed["whh"],
      packed["bias"], packed["wdec"], packed["bdec"])

    return logits3.reshape(T, O), hout.reshape(2, 1, H)


def rnn_forward(packed, token, hidden):
    """Exact equivalent of RNN.forward(input, hidden) for a single token."""
    return rnn_forward_seq(packed, jnp.asarray([token], jnp.int32), hidden)


def init_params(key, input_size, hidden_size, output_size):
    """Raw (PyTorch-layout-ish) parameters: per-direction, per-gate [r, z, n], in->out."""
    ks = jax.random.split(key, 7)
    k = 1.0 / float(hidden_size) ** 0.5
    emb = jax.random.normal(ks[0], (input_size, hidden_size), jnp.float32)
    wih = jax.random.uniform(ks[1], (2, 3, hidden_size, hidden_size), jnp.float32, -k, k)
    whh = jax.random.uniform(ks[2], (2, 3, hidden_size, hidden_size), jnp.float32, -k, k)
    bih = jax.random.uniform(ks[3], (2, 3, hidden_size), jnp.float32, -k, k)
    bhh = jax.random.uniform(ks[4], (2, 3, hidden_size), jnp.float32, -k, k)
    # TODO(synk): the original module declares nn.Linear(hidden_size, output_size), but the
    # bidirectional GRU emits 2*hidden_size features, so forward() would raise a shape error
    # in PyTorch; the decoder is widened to 2*hidden_size here to keep the pipeline runnable.
    wdec = jax.random.uniform(ks[5], (2, hidden_size, output_size), jnp.float32, -k, k)
    bdec = jax.random.uniform(ks[6], (output_size,), jnp.float32, -k, k)
    return dict(emb=emb, wih=wih, whh=whh, bih=bih, bhh=bhh, wdec=wdec, bdec=bdec)


def pack_params(raw, weight_dtype=jnp.bfloat16):
    """Repack raw params into the fused, lane-dense layout the kernel consumes."""
    V, H = raw["emb"].shape
    O = raw["wdec"].shape[-1]
    # Column order: gate-major, direction-minor  [r_f | r_b | z_f | z_b | n_f | n_b].
    wih_all = jnp.concatenate(
        [jnp.concatenate([raw["wih"][0, g], raw["wih"][1, g]], axis=1) for g in range(3)],
        axis=1)                                                      # (H, 6H)
    whh_blk = jnp.zeros((2 * H, 6 * H), jnp.float32)
    for d in range(2):
        for g in range(3):
            whh_blk = whh_blk.at[d * H:(d + 1) * H,
                                 g * 2 * H + d * H: g * 2 * H + (d + 1) * H].set(raw["whh"][d, g])

    def cat2(a):  # (2, H) -> (2H,)  as [fwd | bwd]
        return jnp.concatenate([a[0], a[1]], axis=0)

    b_r = cat2(raw["bih"][:, 0] + raw["bhh"][:, 0])   # folded (r)
    b_z = cat2(raw["bih"][:, 1] + raw["bhh"][:, 1])   # folded (z)
    b_in = cat2(raw["bih"][:, 2])                     # kept separate (n)
    b_hn = cat2(raw["bhh"][:, 2])                     # kept separate (r multiplies it)
    bias = jnp.stack([b_r, b_z, b_in, b_hn], axis=0)  # (4, 2H)

    wdec = jnp.concatenate([raw["wdec"][0], raw["wdec"][1]], axis=0)   # (2H, O)
    return dict(
        emb=raw["emb"].reshape(V, 1, H).astype(weight_dtype),
        wih=wih_all.astype(weight_dtype),
        whh=whh_blk.astype(weight_dtype),
        bias=bias.astype(jnp.float32),
        wdec=wdec.astype(weight_dtype),
        bdec=raw["bdec"].reshape(1, O).astype(jnp.float32),
    )


def rnn_ref(raw, tokens, hidden, weight_dtype=jnp.bfloat16):
    """Plain-JAX reference: PyTorch GRU math with the same bf16 weight storage as the kernel."""
    H = raw["emb"].shape[1]
    q = lambda a: a.astype(weight_dtype).astype(jnp.float32)
    emb = q(raw["emb"])
    wdec = jnp.concatenate([q(raw["wdec"][0]), q(raw["wdec"][1])], axis=0)
    h = hidden[:, 0, :].astype(jnp.float32)                 # (2, H)
    outs = []
    for i in range(tokens.shape[0]):
        x = emb[tokens[i]].reshape(1, H)
        new_h = []
        for d in range(2):
            hd = h[d:d + 1]
            hq = q(hd)
            gi = [x @ q(raw["wih"][d, g]) + raw["bih"][d, g][None, :] for g in range(3)]
            gh = [hq @ q(raw["whh"][d, g]) + raw["bhh"][d, g][None, :] for g in range(3)]
            r = jax.nn.sigmoid(gi[0] + gh[0])
            z = jax.nn.sigmoid(gi[1] + gh[1])
            n = jnp.tanh(gi[2] + r * gh[2])
            new_h.append((1.0 - z) * n + z * hd)
        h = jnp.concatenate(new_h, axis=0)                   # (2, H)
        outs.append(q(h.reshape(1, 2 * H)) @ wdec + raw["bdec"][None, :])
    return jnp.concatenate(outs, axis=0), h[:, None, :]


if __name__ == "__main__":
    input_size, hidden_size, output_size, n_layers = 64, 32, 16, 1
    seq_len = 8

    key = jax.random.PRNGKey(0)
    pkey, tkey = jax.random.split(key)
    raw = init_params(pkey, input_size, hidden_size, output_size)
    packed = pack_params(raw)

    # initHidden-style zeros; bidirectional -> 2 * n_layers
    hidden0 = jnp.zeros((2 * n_layers, 1, hidden_size), jnp.float32)

    # 1) single-token forward: equivalent of RNN.forward(input, hidden)
    token = int(jax.random.randint(tkey, (1,), 0, input_size)[0])
    logits1, hidden1 = rnn_forward(packed, token, hidden0)
    jax.block_until_ready((logits1, hidden1))
    assert logits1.shape == (1, output_size)
    assert hidden1.shape == (2 * n_layers, 1, hidden_size)
    assert bool(jnp.all(jnp.isfinite(logits1))) and bool(jnp.all(jnp.isfinite(hidden1)))

    # 2) whole token sequence fused in one pallas_call (grid over T, weights resident)
    tokens = jax.random.randint(tkey, (seq_len,), 0, input_size, dtype=jnp.int32)
    seq_logits, seq_hidden = rnn_forward_seq(packed, tokens, hidden0)
    jax.block_until_ready((seq_logits, seq_hidden))
    assert seq_logits.shape == (seq_len, output_size)
    assert seq_hidden.shape == (2 * n_layers, 1, hidden_size)

    # correctness vs. plain-JAX reference (same bf16 weight storage, PyTorch GRU math)
    ref_logits, ref_hidden = rnn_ref(raw, tokens, hidden0)
    assert bool(jnp.allclose(seq_logits, ref_logits, atol=1e-3, rtol=1e-3))
    assert bool(jnp.allclose(seq_hidden, ref_hidden, atol=1e-3, rtol=1e-3))

    print("KERNEL_OK")
</pallas_src>

<mosaic_0001>
module attributes {stable_mosaic.version = 11 : i64} {
  func.func @gru_seq_kernel(%arg0: i32, %arg1: memref<1xi32, #tpu.memory_space<smem>>, %arg2: memref<1x1x32xbf16, #tpu.memory_space<vmem>>, %arg3: memref<1x64xf32, #tpu.memory_space<vmem>>, %arg4: memref<32x192xbf16, #tpu.memory_space<vmem>>, %arg5: memref<64x192xbf16, #tpu.memory_space<vmem>>, %arg6: memref<4x64xf32, #tpu.memory_space<vmem>>, %arg7: memref<64x16xbf16, #tpu.memory_space<vmem>>, %arg8: memref<1x16xf32, #tpu.memory_space<vmem>>, %arg9: memref<1x1x16xf32, #tpu.memory_space<vmem>>, %arg10: memref<1x64xf32, #tpu.memory_space<vmem>>) attributes {dimension_semantics = [#tpu.dimension_semantics<arbitrary>], iteration_bounds = array<i64: 1>, scalar_prefetch = 1 : i64, scratch_operands = 0 : i64, tpu.core_type = #tpu.core_type<tc>, window_params = [{transform_indices = @transform_0, window_bounds = array<i64: 1, 1, 32>}, {pipeline_mode = #tpu.pipeline_mode<synchronous>, transform_indices = @transform_1, window_bounds = array<i64: 1, 64>}, {pipeline_mode = #tpu.pipeline_mode<synchronous>, transform_indices = @transform_2, window_bounds = array<i64: 32, 192>}, {pipeline_mode = #tpu.pipeline_mode<synchronous>, transform_indices = @transform_3, window_bounds = array<i64: 64, 192>}, {pipeline_mode = #tpu.pipeline_mode<synchronous>, transform_indices = @transform_4, window_bounds = array<i64: 4, 64>}, {pipeline_mode = #tpu.pipeline_mode<synchronous>, transform_indices = @transform_5, window_bounds = array<i64: 64, 16>}, {pipeline_mode = #tpu.pipeline_mode<synchronous>, transform_indices = @transform_6, window_bounds = array<i64: 1, 16>}, {transform_indices = @transform_7, window_bounds = array<i64: 1, 1, 16>}, {pipeline_mode = #tpu.pipeline_mode<synchronous>, transform_indices = @transform_8, window_bounds = array<i64: 1, 64>}]} {
    %c0_i32 = arith.constant 0 : i32
    %0 = arith.cmpi eq, %arg0, %c0_i32 : i32
    %1 = arith.extui %0 : i1 to i32
    %c0_i32_0 = arith.constant 0 : i32
    %2 = arith.cmpi ne, %1, %c0_i32_0 : i32
    scf.if %2 {
      %c0_28 = arith.constant 0 : index
      %c0_29 = arith.constant 0 : index
      %53 = vector.load %arg3[%c0_28, %c0_29] : memref<1x64xf32, #tpu.memory_space<vmem>>, vector<1x64xf32>
      %c0_30 = arith.constant 0 : index
      %c0_31 = arith.constant 0 : index
      %54 = vector.load %arg10[%c0_30, %c0_31] : memref<1x64xf32, #tpu.memory_space<vmem>>, vector<1x64xf32>
      tpu.vector_store %arg10[%c0_30, %c0_31], %53 {strides = array<i32>} : memref<1x64xf32, #tpu.memory_space<vmem>>, vector<1x64xf32>,
    } else {
    }
    %c0 = arith.constant 0 : index
    %c0_1 = arith.constant 0 : index
    %c0_2 = arith.constant 0 : index
    %3 = vector.load %arg2[%c0, %c0_1, %c0_2] : memref<1x1x32xbf16, #tpu.memory_space<vmem>>, vector<1x1x32xbf16>
    %4 = vector.shape_cast %3 : vector<1x1x32xbf16> to vector<1x32xbf16>
    %c0_3 = arith.constant 0 : index
    %c0_4 = arith.constant 0 : index
    %5 = vector.load %arg10[%c0_3, %c0_4] : memref<1x64xf32, #tpu.memory_space<vmem>>, vector<1x64xf32>
    %c0_5 = arith.constant 0 : index
    %c0_6 = arith.constant 0 : index
    %6 = vector.load %arg4[%c0_5, %c0_6] : memref<32x192xbf16, #tpu.memory_space<vmem>>, vector<32x192xbf16>
    %cst = arith.constant dense<0.000000e+00> : vector<1x192xf32>
    %7 = tpu.matmul %4, %6, %cst {dimension_numbers = #tpu.dot_dimension_numbers<[1], [0], [0], [1], [0, 0, 1, 1], [], []>} : vector<1x32xbf16>, vector<32x192xbf16>, vector<1x192xf32> -> vector<1x192xf32>
    %8 = arith.truncf %5 : vector<1x64xf32> to vector<1x64xbf16>
    %c0_7 = arith.constant 0 : index
    %c0_8 = arith.constant 0 : index
    %9 = vector.load %arg5[%c0_7, %c0_8] : memref<64x192xbf16, #tpu.memory_space<vmem>>, vector<64x192xbf16>
    %cst_9 = arith.constant dense<0.000000e+00> : vector<1x192xf32>
    %10 = tpu.matmul %8, %9, %cst_9 {dimension_numbers = #tpu.dot_dimension_numbers<[1], [0], [0], [1], [0, 0, 1, 1], [], []>} : vector<1x64xbf16>, vector<64x192xbf16>, vector<1x192xf32> -> vector<1x192xf32>
    %11 = vector.extract_strided_slice %7 {offsets = [0, 0], sizes = [1, 64], strides = [1, 1]} : vector<1x192xf32> to vector<1x64xf32>
    %12 = vector.extract_strided_slice %7 {offsets = [0, 64], sizes = [1, 64], strides = [1, 1]} : vector<1x192xf32> to vector<1x64xf32>
    %13 = vector.extract_strided_slice %7 {offsets = [0, 128], sizes = [1, 64], strides = [1, 1]} : vector<1x192xf32> to vector<1x64xf32>
    %14 = vector.extract_strided_slice %10 {offsets = [0, 0], sizes = [1, 64], strides = [1, 1]} : vector<1x192xf32> to vector<1x64xf32>
    %15 = vector.extract_strided_slice %10 {offsets = [0, 64], sizes = [1, 64], strides = [1, 1]} : vector<1x192xf32> to vector<1x64xf32>
    %16 = vector.extract_strided_slice %10 {offsets = [0, 128], sizes = [1, 64], strides = [1, 1]} : vector<1x192xf32> to vector<1x64xf32>
    %17 = arith.addf %11, %14 : vector<1x64xf32>
    %c0_10 = arith.constant 0 : index
    %c0_11 = arith.constant 0 : index
    %18 = vector.load %arg6[%c0_10, %c0_11] : memref<4x64xf32, #tpu.memory_space<vmem>>, vector<1x64xf32>
    %19 = arith.addf %17, %18 : vector<1x64xf32>
    %20 = arith.negf %19 : vector<1x64xf32>
    %21 = math.exp %20 : vector<1x64xf32>
    %cst_12 = arith.constant 1.000000e+00 : f32
    %22 = vector.broadcast %cst_12 : f32 to vector<1x64xf32>
    %23 = arith.addf %22, %21 : vector<1x64xf32>
    %24 = arith.divf %22, %23 : vector<1x64xf32>
    %25 = arith.addf %12, %15 : vector<1x64xf32>
    %c1 = arith.constant 1 : index
    %c0_13 = arith.constant 0 : index
    %26 = vector.load %arg6[%c1, %c0_13] : memref<4x64xf32, #tpu.memory_space<vmem>>, vector<1x64xf32>
    %27 = arith.addf %25, %26 : vector<1x64xf32>
    %28 = arith.negf %27 : vector<1x64xf32>
    %29 = math.exp %28 : vector<1x64xf32>
    %cst_14 = arith.constant 1.000000e+00 : f32
    %30 = vector.broadcast %cst_14 : f32 to vector<1x64xf32>
    %31 = arith.addf %30, %29 : vector<1x64xf32>
    %32 = arith.divf %30, %31 : vector<1x64xf32>
    %c2 = arith.constant 2 : index
    %c0_15 = arith.constant 0 : index
    %33 = vector.load %arg6[%c2, %c0_15] : memref<4x64xf32, #tpu.memory_space<vmem>>, vector<1x64xf32>
    %34 = arith.addf %13, %33 : vector<1x64xf32>
    %c3 = arith.constant 3 : index
    %c0_16 = arith.constant 0 : index
    %35 = vector.load %arg6[%c3, %c0_16] : memref<4x64xf32, #tpu.memory_space<vmem>>, vector<1x64xf32>
    %36 = arith.addf %16, %35 : vector<1x64xf32>
    %37 = arith.mulf %24, %36 : vector<1x64xf32>
    %38 = arith.addf %34, %37 : vector<1x64xf32>
    %39 = math.tanh %38 : vector<1x64xf32>
    %cst_17 = arith.constant 1.000000e+00 : f32
    %40 = vector.broadcast %cst_17 : f32 to vector<1x64xf32>
    %41 = arith.subf %40, %32 : vector<1x64xf32>
    %42 = arith.mulf %41, %39 : vector<1x64xf32>
    %43 = arith.mulf %32, %5 : vector<1x64xf32>
    %44 = arith.addf %42, %43 : vector<1x64xf32>
    %c0_18 = arith.constant 0 : index
    %c0_19 = arith.constant 0 : index
    %45 = vector.load %arg10[%c0_18, %c0_19] : memref<1x64xf32, #tpu.memory_space<vmem>>, vector<1x64xf32>
    tpu.vector_store %arg10[%c0_18, %c0_19], %44 {strides = array<i32>} : memref<1x64xf32, #tpu.memory_space<vmem>>, vector<1x64xf32>,
    %46 = arith.truncf %44 : vector<1x64xf32> to vector<1x64xbf16>
    %c0_20 = arith.constant 0 : index
    %c0_21 = arith.constant 0 : index
    %47 = vector.load %arg7[%c0_20, %c0_21] : memref<64x16xbf16, #tpu.memory_space<vmem>>, vector<64x16xbf16>
    %cst_22 = arith.constant dense<0.000000e+00> : vector<1x16xf32>
    %48 = tpu.matmul %46, %47, %cst_22 {dimension_numbers = #tpu.dot_dimension_numbers<[1], [0], [0], [1], [0, 0, 1, 1], [], []>} : vector<1x64xbf16>, vector<64x16xbf16>, vector<1x16xf32> -> vector<1x16xf32>
    %c0_23 = arith.constant 0 : index
    %c0_24 = arith.constant 0 : index
    %49 = vector.load %arg8[%c0_23, %c0_24] : memref<1x16xf32, #tpu.memory_space<vmem>>, vector<1x16xf32>
    %50 = arith.addf %48, %49 : vector<1x16xf32>
    %51 = vector.shape_cast %50 : vector<1x16xf32> to vector<1x1x16xf32>
    %c0_25 = arith.constant 0 : index
    %c0_26 = arith.constant 0 : index
    %c0_27 = arith.constant 0 : index
    %52 = vector.load %arg9[%c0_25, %c0_26, %c0_27] : memref<1x1x16xf32, #tpu.memory_space<vmem>>, vector<1x1x16xf32>
    tpu.vector_store %arg9[%c0_25, %c0_26, %c0_27], %51 {strides = array<i32>} : memref<1x1x16xf32, #tpu.memory_space<vmem>>, vector<1x1x16xf32>,
    return
  }
  func.func @transform_0(%arg0: i32, %arg1: memref<1xi32, #tpu.memory_space<smem>>) -> (i32, i32, i32) {
    %0 = arith.index_cast %arg0 : i32 to index
    %1 = memref.load %arg1[%0] : memref<1xi32, #tpu.memory_space<smem>>
    %c0_i32 = arith.constant 0 : i32
    %c0_i32_0 = arith.constant 0 : i32
    %c0_i32_1 = arith.constant 0 : i32
    return %1, %c0_i32, %c0_i32_0 : i32, i32, i32
  }
  func.func @transform_1(%arg0: i32, %arg1: memref<1xi32, #tpu.memory_space<smem>>) -> (i32, i32) {
    %c0_i32 = arith.constant 0 : i32
    %c0_i32_0 = arith.constant 0 : i32
    %c0_i32_1 = arith.constant 0 : i32
    return %c0_i32, %c0_i32_0 : i32, i32
  }
  func.func @transform_2(%arg0: i32, %arg1: memref<1xi32, #tpu.memory_space<smem>>) -> (i32, i32) {
    %c0_i32 = arith.constant 0 : i32
    %c0_i32_0 = arith.constant 0 : i32
    %c0_i32_1 = arith.constant 0 : i32
    return %c0_i32, %c0_i32_0 : i32, i32
  }
  func.func @transform_3(%arg0: i32, %arg1: memref<1xi32, #tpu.memory_space<smem>>) -> (i32, i32) {
    %c0_i32 = arith.constant 0 : i32
    %c0_i32_0 = arith.constant 0 : i32
    %c0_i32_1 = arith.constant 0 : i32
    return %c0_i32, %c0_i32_0 : i32, i32
  }
  func.func @transform_4(%arg0: i32, %arg1: memref<1xi32, #tpu.memory_space<smem>>) -> (i32, i32) {
    %c0_i32 = arith.constant 0 : i32
    %c0_i32_0 = arith.constant 0 : i32
    %c0_i32_1 = arith.constant 0 : i32
    return %c0_i32, %c0_i32_0 : i32, i32
  }
  func.func @transform_5(%arg0: i32, %arg1: memref<1xi32, #tpu.memory_space<smem>>) -> (i32, i32) {
    %c0_i32 = arith.constant 0 : i32
    %c0_i32_0 = arith.constant 0 : i32
    %c0_i32_1 = arith.constant 0 : i32
    return %c0_i32, %c0_i32_0 : i32, i32
  }
  func.func @transform_6(%arg0: i32, %arg1: memref<1xi32, #tpu.memory_space<smem>>) -> (i32, i32) {
    %c0_i32 = arith.constant 0 : i32
    %c0_i32_0 = arith.constant 0 : i32
    %c0_i32_1 = arith.constant 0 : i32
    return %c0_i32, %c0_i32_0 : i32, i32
  }
  func.func @transform_7(%arg0: i32, %arg1: memref<1xi32, #tpu.memory_space<smem>>) -> (i32, i32, i32) {
    %c0_i32 = arith.constant 0 : i32
    %c0_i32_0 = arith.constant 0 : i32
    %c0_i32_1 = arith.constant 0 : i32
    return %arg0, %c0_i32, %c0_i32_0 : i32, i32, i32
  }
  func.func @transform_8(%arg0: i32, %arg1: memref<1xi32, #tpu.memory_space<smem>>) -> (i32, i32) {
    %c0_i32 = arith.constant 0 : i32
    %c0_i32_0 = arith.constant 0 : i32
    %c0_i32_1 = arith.constant 0 : i32
    return %c0_i32, %c0_i32_0 : i32, i32
  }
}

</mosaic_0001>

<bundles_post_ra>
// kernel: tpu_custom_call.1
= control target key start
LH: loop header
LB: loop body
LE: loop exit
PB: predicated region body
PF: predicated region fallthrough
CT: control target
= control target key end

     0   :  { %16 = vsyncpa [#allocation5], 0  ;;  %v506_v2 = vmov 0   ;;  %v254_v7 = vlaneseq  ;;  %vm80_vm0 = vcmask 261120   ;;  %vm52_vm1 = vcmask 516096   ;;  %s507_s20 = smov 64   ;;  %s671_s0 = inlined_call_operand.<no memory space> [shape: s32[1], index: 0, kind: input, shape index: {}]   ;;  %s672_s1 = inlined_call_operand.vmem [shape: bf16[64,1,32], index: 1, kind: input, shape index: {}]   ;;  %s673_s2 = inlined_call_operand.vmem [shape: f32[1,64], index: 2, kind: input, shape index: {}]   ;;  %s674_s3 = inlined_call_operand.vmem [shape: bf16[32,192], index: 3, kind: input, shape index: {}]   ;;  %s675_s4 = inlined_call_operand.vmem [shape: bf16[64,192], index: 4, kind: input, shape index: {}]   ;;  %s676_s5 = inlined_call_operand.vmem [shape: f32[4,64], index: 5, kind: input, shape index: {}]   ;;  %s677_s6 = inlined_call_operand.vmem [shape: bf16[64,16], index: 6, kind: input, shape index: {}]   ;;  %s678_s7 = inlined_call_operand.vmem [shape: f32[1,16], index: 7, kind: input, shape index: {}]   ;;  %s679_s8 = inlined_call_operand.hbm [shape: f32[1,1,16], index: 8, kind: output, shape index: {0}]   ;;  %s680_s9 = inlined_call_operand.hbm [shape: f32[1,64], index: 9, kind: output, shape index: {1}]  }
   0x1   :  { %v426_v0 = vld [vmem:[%s675_s4 + $0x4] ss:$8 sps:$4 sm:$0xff]   ;;  %p42_p0 = scmp.lt.s32.totalorder %s671_s0, 63  ;;  %v428_v1 = vld [vmem:[%s675_s4] ss:$8 sps:$4 sm:$0xff]   ;;  %116 = vmatprep.mubr.bf16.mxu0 %v506_v2  ;;  %210 = vmatprep.mubr.bf16.mxu1 %v506_v2 }
   0x2   :  { %178 = vmatprep.subr.bf16.mxu1 %v426_v0  ;;  %v429_v3 = vld [vmem:[%s675_s4 + $0x14] ss:$8 sps:$4 sm:$0xff]   ;;  %v431_v4 = vld [vmem:[%s674_s3 + $0x4] ss:$8 sps:$4 sm:$0xff]   ;;  %v433_v5 = vld [vmem:[%s675_s4 + $0x10] ss:$8 sps:$4 sm:$0xff]  }
   0x3   :  { %s682_s0 = smov (!%p42_p0, %s671_s0), 63  ;;  %179 = vmatpush1.bf16.msra.mxu1 %v428_v1  ;;  %v434_v6 = vld [vmem:[%s674_s3] ss:$8 sps:$4 sm:$0xff]   ;;  %v435_v8 = vld [vmem:[%s675_s4 + $0x24] ss:$8 sps:$4 sm:$0xff]   ;;  %84 = vmatprep.subr.bf16.mxu0 %v431_v4  ;;  %v255_v13 = vshrl.u32 %v254_v7, 7 }
   0x4   :  { %180 = vmatprep.subr.bf16.mxu1 %v429_v3  ;;  %v437_v9 = vld [vmem:[%s674_s3 + $0x14] ss:$8 sps:$4 sm:$0xff]   ;;  %s44_s10 = scalar_lea.vmem %s672_s1, %s682_s0  ;;  %85 = vmatpush1.bf16.msra.mxu0 %v434_v6  ;;  %v440_v10 = vld [vmem:[%s674_s3 + $0x10] ss:$8 sps:$4 sm:$0xff]   ;;  %v439_v11 = vld [vmem:[%s675_s4 + $0x20] ss:$8 sps:$4 sm:$0xff]  }
   0x5   :  { %86 = vmatprep.subr.bf16.mxu0 %v437_v9  ;;  %v441_v12 = vld [vmem:[%s675_s4 + $0x34] ss:$8 sps:$4 sm:$0xff]   ;;  %v54_v14 = vld [vmem:[%s44_s10] sm:$0x1]  ;;  %v228_v16 = vld [vmem:[%s676_s5 + $0x1] sm:$0x1] }
   0x6   :  { %v51_v15 = vld [vmem:[%s673_s2] sm:$0x1]  ;;  %v443_v17 = vld [vmem:[%s675_s4 + $0x30] ss:$8 sps:$4 sm:$0xff]   ;;  %230 = vrot.lane.b32.xlu0 %v228_v16, %s507_s20 }
   0x7   :  { %181 = vmatpush1.bf16.msra.mxu1 %v433_v5  ;;  %53 = vst.msk [vmem:[#allocation6] sm:$0x1] %vm52_vm1, %v51_v15 }
   0x8   :  { %182 = vmatprep.subr.bf16.mxu1 %v435_v8  ;;  %87 = vmatpush1.bf16.msra.mxu0 %v440_v10 }
   0xb   :  { %183 = vmatpush1.bf16.msra.mxu1 %v439_v11 }
   0xc   :  { %17 = vsyncpa [#allocation7], 0  ;;  %184 = vmatprep.subr.bf16.mxu1 %v441_v12  ;;  %386 = vmatmul.mubr.msk.bf16.vlgmr.msra.gmra.mrb[0].mxu0 %vm80_vm0, %v54_v14  ;;  %v256_v18 = vsub.s32 0, %v255_v13  ;;  %vm174_vm2 = vcmask 523264   ;;  %v220_v27 = vld [vmem:[%s676_s5] sm:$0x1] }
   0xd   :  { %v242_v36 = vld [vmem:[%s676_s5 + $0x3] sm:$0x1]  ;;  %v240_v37 = vld [vmem:[%s676_s5 + $0x2] sm:$0x1]  ;;  %v508_v44 = vmov 0.0   ;;  %v445_v45 = vld [vmem:[%s677_s6 + $0x8] sm:$0xff]  }
   0xe   :  { %v55_v19 = vld [vmem:[#allocation6] sm:$0x1]  ;;  %408 = vmatprep.subr.bf16.mxu0 %v508_v44  ;;  %v446_v47 = vld [vmem:[%s677_s6 + $0x10] sm:$0xff]   ;;  %v447_v48 = vld [vmem:[%s677_s6 + $0x18] sm:$0xff]   ;;  %vm509_vm3 = vmmov 0  }
   0xf   :  { %185 = vmatpush1.bf16.msra.mxu1 %v443_v17  ;;  %v125_v20 = vpack.c.bf16 %v55_v19, %v55_v19  ;;  %v257_v21 = vrot.slane %v55_v19, %v256_v18  ;;  %v444_v43 = vld [vmem:[%s677_s6] sm:$0xff]   ;;  %416 = vmatprep.mubr.msk.bf16.mxu0 %vm509_vm3, %v508_v44  ;;  %s510_s6 = smov [#allocation6]  }
  0x10   :  { %409 = vmatpush3.bf16.msra.mxu0 %v444_v43  ;;  %s367_s11 = sshll.u32 %s510_s6, 4  ;;  %s368_s11 = int_to_ptr.vmem [resolvable:$true] %s367_s11 }
  0x11   :  { %258 = vrot.lane.b32.xlu1 %v257_v21, %s507_s20  ;;  %410 = vmatprep.subr.bf16.mxu0 %v508_v44  ;;  %s458_s12 = scalar_lea.vmem %s368_s11, 16  ;;  %s462_s13 = scalar_lea.vmem %s368_s11, 32 }
  0x12   :  { %395 = vmatmul.mubr.msk.bf16.vlgmr.msra.gmra.mrb[0].mxu1 %vm174_vm2, %v125_v20  ;;  %p459_p1 = scmp.ne.s32.totalorder %s368_s11, %s458_s12  ;;  %p463_p2 = scmp.lt.s32.totalorder %s368_s11, %s368_s11 }
  0x13   :  { %p464_p3 = scmp.lt.s32.totalorder %s462_s13, %s458_s12 }
  0x14   :  { %411 = vmatpush3.bf16.msra.mxu0 %v445_v45 }
  0x15   :  { %412 = vmatprep.subr.bf16.mxu0 %v508_v44  ;;  %p465_p4 = por %p464_p3, %p463_p2 }
  0x17   :  { %p466_p5 = pnand %p465_p4, %p459_p1 }
  0x18   :  { %413 = vmatpush3.bf16.msra.mxu0 %v446_v47 }
  0x19   :  { %414 = vmatprep.subr.bf16.mxu0 %v508_v44 }
  0x1c   :  { %415 = vmatpush3.bf16.msra.mxu0 %v447_v48 }
  0x78   :  { %v231_v49 = vpop.permute.xlu0 %230 }
  0x83   :  { %v259_v55 = vpop.permute.xlu1 %258 }
  0xdf   :  { %v118_v22 = vpop.f32.mrb[0].mxu0 }
  0xe0   :  { %v120_v23 = vpop.f32.mrb[1].mxu0 }
  0xe1   :  { %v122_v24 = vpop.f32.mrb[2].mxu0  ;;  %v241_v40 = vadd.f32 %v240_v37, %v120_v23 }
  0xe2   :  { %v123_v25 = vpop.f32.mrb[3].mxu0 }
  0xe5   :  { %v212_v26 = vpop.f32.mrb[0].mxu1 }
  0xe6   :  { %v219_v28 = vadd.f32 %v212_v26, %v118_v22  ;;  %v214_v29 = vpop.f32.mrb[1].mxu1 }
  0xe7   :  { %v216_v30 = vpop.f32.mrb[2].mxu1  ;;  %v243_v38 = vadd.f32 %v242_v36, %v214_v29 }
  0xe8   :  { %v221_v31 = vadd.f32 %v220_v27, %v219_v28  ;;  %v217_v32 = vpop.f32.mrb[3].mxu1  ;;  %v233_v50 = vadd.f32 %v231_v49, %v219_v28 }
  0xea   :  { %v396_v33 = vmul.f32 -1.442695, %v221_v31  ;;  %v397_v51 = vmul.f32 -1.442695, %v233_v50 }
  0xec   :  { %448 = vpow2.f32 %v396_v33 }
  0xf6   :  { %v449_v34 = vpop.eup %448 }
  0xf7   :  { %v225_v35 = vadd.f32 1.0, %v449_v34 }
  0xf9   :  { %450 = vrcp.f32 %v225_v35 }
 0x103   :  { %v451_v39 = vpop.eup %450 }
 0x104   :  { %v244_v41 = vmul.f32 %v451_v39, %v243_v38 }
 0x106   :  { %v245_v42 = vadd.f32 %v244_v41, %v241_v40 }
 0x108   :  { %452 = vtanh.f32 %v245_v42 }
 0x109   :  { %454 = vpow2.f32 %v397_v51 }
 0x112   :  { %v453_v46 = vpop.eup %452 }
 0x113   :  { %249 = vrot.lane.b32.xlu0 %v453_v46, %s507_s20  ;;  %v455_v52 = vpop.eup %454 }
 0x114   :  { %v237_v53 = vadd.f32 1.0, %v455_v52 }
 0x116   :  { %456 = vrcp.f32 %v237_v53 }
 0x120   :  { %v457_v54 = vpop.eup %456 }
 0x121   :  { %v247_v56 = vsub.f32 1.0, %v457_v54  ;;  %v261_v58 = vmul.f32 %v457_v54, %v259_v55 }
 0x185   :  { %v250_v57 = vpop.permute.xlu0 %249 }
 0x186   :  { %v252_v59 = vmul.f32 %v250_v57, %v247_v56 }
 0x188   :  { %v262_v60 = vadd.f32 %v261_v58, %v252_v59 }
 0x18a   :  { %264 = vrot.lane.b32.xlu0 %v262_v60, %s507_s20  ;;  %v269_v61 = vpack.c.bf16 %v262_v60, %v262_v60 }
 0x18c   :  { %280 = vrot.lane.b32.xlu1 %v269_v61, %s507_s20 }
 0x1fc   :  { %v265_v62 = vpop.permute.xlu0 %264 }
 0x1fd   :  { %268 = vst.msk [vmem:[#allocation6] sm:$0x1] %vm52_vm1, %v265_v62 }
 0x1fe   :  { %v281_v63 = vpop.permute.xlu1 %280 }
 0x1ff   :  { %417 = vmatmul.mubr.msk.bf16.vlgmr.msra.gmra.mrb[4].mxu0 %vm174_vm2, %v281_v63 }
 0x200   :  { %469 = shalt.err (!%p466_p5)
}
 0x201   :  { %s470_s16 = scalar_lea.hbm %s680_s9, 16 }
 0x202   :  { %p471_p6 = scmp.ne.s32.totalorder %s680_s9, %s470_s16  ;;  %p474_p7 = scmp.lt.u32.totalorder %s470_s16, %s680_s9 }
 0x204   :  { %p476_p8 = pnand %p474_p7, %p471_p6 }
 0x206   :  { %479 = shalt.err (!%p476_p8)
}
 0x207   :  { %370 = dma.vmem_to_hbm [thread:$0]  %s368_s11, 16, %s680_s9, [#allocation7]   ;;  %v278_v0 = vld [vmem:[%s678_s7] sm:$0x1]  ;;  %vm349_vm4 = vcmask 122880  }
 0x208   :  { %s511_s4 = smov [#allocation4]  }
 0x209   :  { %s357_s21 = sshll.u32 %s511_s4, 4  ;;  %s358_s21 = int_to_ptr.vmem [resolvable:$true] %s357_s21 }
 0x20a   :  { %s480_s22 = scalar_lea.vmem %s358_s21, 16  ;;  %s484_s23 = scalar_lea.vmem %s358_s21, 32 }
 0x20b   :  { %p481_p9 = scmp.ne.s32.totalorder %s358_s21, %s480_s22  ;;  %p485_p10 = scmp.lt.s32.totalorder %s358_s21, %s358_s21 }
 0x20c   :  { %p486_p11 = scmp.lt.s32.totalorder %s484_s23, %s480_s22 }
 0x20e   :  { %p487_p12 = por %p486_p11, %p485_p10 }
 0x210   :  { %p488_p13 = pnand %p487_p12, %p481_p9 }
 0x2d2   :  { %v343_v1 = vpop.f32.mrb[4].mxu0 }
 0x2d3   :  { %v344_v2 = vadd.f32 %v343_v1, %v278_v0  ;;  %v418_v3 = vpop.f32.mrb[5].mxu0 }
 0x2d4   :  { %v346_v4 = vpop.f32.mrb[6].mxu0 }
 0x2d5   :  { %v419_v5 = vpop.f32.mrb[7].mxu0  ;;  %350 = vst.msk [vmem:[#allocation4] sm:$0x1] %vm349_vm4, %v344_v2 }
 0x2d6   :  { %491 = shalt.err (!%p488_p13)
}
 0x2d7   :  { %s492_s24 = scalar_lea.hbm %s679_s8, 16 }
 0x2d8   :  { %p493_p0 = scmp.ne.s32.totalorder %s679_s8, %s492_s24  ;;  %p496_p1 = scmp.lt.u32.totalorder %s492_s24, %s679_s8 }
 0x2da   :  { %p498_p2 = pnand %p496_p1, %p493_p0 }
 0x2dc   :  { %501 = shalt.err (!%p498_p2)
}
 0x2dd   :  { %360 = dma.vmem_to_hbm [thread:$0]  %s358_s21, 16, %s679_s8, [#allocation5]  }
 0x2de   :  { %502 = dma.done.wait [#allocation5], 16  }
 0x2df   :  { %503 = vsyncadd [#allocation5], 4294967280 }
 0x2e0   :  { %504 = dma.done.wait [#allocation7], 16  }
 0x2e1   :  { %505 = vsyncadd [#allocation7], 4294967280 }
 0x2e2   :  { %377 = vsyncpa [#allocation5], 1 }
 0x2e3   :  { %378 = vsyncpa [#allocation7], 1 }

</bundles_post_ra>
